<compile_context>
chip_gen: v7x
topology: tpu7x:2x2x1
jax: 0.10.0
libtpu: 0.0.40
codegen_flags: <defaults>
</compile_context>

<pallas_src>
import functools

import jax
import jax.numpy as jnp
import numpy as np
from jax import lax
from jax.experimental import pallas as pl
from jax.experimental.pallas import tpu as pltpu


_ROW_ALIGN = 128                       # out tile = multiple of 128 lanes (also /16 for bf16)
_TRANS_B = (((1,), (1,)), ((), ()))    # contract last dims of both operands: lhs @ rhs^T


def _round_up(x, m):
    return ((x + m - 1) // m) * m


def neumf_kernel(act_ref, w1_ref, w2_ref, w3_ref, const_ref, out_ref,
                 *, d_in, d_mf, n1, n2, n3):
    """One batch tile of NeuMF: 3-layer MLP tower + MF product + affine head.

    act_ref   : (tb, d_in + 2*d_mf) bf16  packed [user_mlp | item_mlp | user_mf | item_mf]
    w1/w2/w3  : bf16 MLP weights, (in, out) layout, VMEM-resident across the grid
    const_ref : (8, >=128) f32, rows = [wa_mlp, wa_mf, ba, b1, b2, b3, 0, 0]
    out_ref   : (1, tb) f32               lane-dense sigmoid(logits) row
    """
    f32 = jnp.float32

    # ---- static slices of the packed activation block -----------------------
    x = act_ref[:, 0:d_in]                                        # (tb, d_in) bf16
    u_mf = act_ref[:, d_in:d_in + d_mf].astype(f32)               # (tb, d_mf) f32
    i_mf = act_ref[:, d_in + d_mf:d_in + 2 * d_mf].astype(f32)    # (tb, d_mf) f32

    # ---- packed constants (biases / head), aligned lane-0 slices -------------
    ba = const_ref[2:3, 0:1]                                      # (1, 1)  f32
    b1 = const_ref[3:4, 0:n1]                                     # (1, n1) f32
    b2 = const_ref[4:5, 0:n2]                                     # (1, n2) f32
    b3 = const_ref[5:6, 0:n3]                                     # (1, n3) f32

    # ---- MLP tower (MXU, bf16 operands, f32 accumulation; f32 ReLU/bias) -----
    h = jnp.dot(x, w1_ref[...], preferred_element_type=f32)
    h = jnp.maximum(h + b1, 0.0)
    h = jnp.dot(h.astype(w2_ref.dtype), w2_ref[...], preferred_element_type=f32)
    h = jnp.maximum(h + b2, 0.0)
    h = jnp.dot(h.astype(w3_ref.dtype), w3_ref[...], preferred_element_type=f32)
    h = jnp.maximum(h + b3, 0.0)                                  # (tb, n3) f32

    # ---- MF tower (VPU, f32 elementwise) --------------------------------------
    mf = u_mf * i_mf                                              # (tb, d_mf) f32

    # ---- affine head, emitted lane-dense --------------------------------------
    # concat(h, mf) @ wa  ==  h @ wa_mlp + mf @ wa_mf.  Each piece is computed
    # as an attention-style NT matmul with the 8-row constant block as LHS, so
    # the result lands as rows of an (8, tb) tile (batch on lanes).  Row 0 of
    # the first matmul is wa_mlp . h, row 1 of the second is wa_mf . mf; the
    # remaining rows are ignored (free: M=8 is a single MXU pass).  This gives
    # lane-dense logits without any in-kernel reshape/transpose.
    head_h = lax.dot_general(const_ref[:, 0:n3].astype(jnp.bfloat16),
                             h.astype(jnp.bfloat16),
                             _TRANS_B, preferred_element_type=f32)    # (8, tb)
    head_mf = lax.dot_general(const_ref[:, 0:d_mf].astype(jnp.bfloat16),
                              mf.astype(jnp.bfloat16),
                              _TRANS_B, preferred_element_type=f32)   # (8, tb)
    logits = head_h[0:1, :] + head_mf[1:2, :] + ba                    # (1, tb)
    out_ref[...] = jax.nn.sigmoid(logits)


def prepare_params(params, compute_dtype=jnp.bfloat16):
    """One-time conversion of the f32 parameters into the kernel's layout.

    bf16 embedding tables / MLP weights (halves gather + weight DMA traffic);
    all small f32 constants packed into a single (8, >=128) block:
        row 0: wa_mlp   row 1: wa_mf   row 2: ba
        row 3: b1       row 4: b2      row 5: b3
    """
    n1 = params["w1"].shape[1]
    n2 = params["w2"].shape[1]
    n3 = params["w3"].shape[1]
    d_mf = params["emb_user_mf"].shape[1]
    cpad = _round_up(max(n1, n2, n3, d_mf, 1), 128)
    consts = jnp.zeros((8, cpad), jnp.float32)
    consts = consts.at[0, :n3].set(params["wa_mlp"].reshape(-1))
    consts = consts.at[1, :d_mf].set(params["wa_mf"].reshape(-1))
    consts = consts.at[2, 0].set(params["ba"].reshape(-1)[0])
    consts = consts.at[3, :n1].set(params["b1"].reshape(-1))
    consts = consts.at[4, :n2].set(params["b2"].reshape(-1))
    consts = consts.at[5, :n3].set(params["b3"].reshape(-1))
    return {
        "emb_user_mlp": params["emb_user_mlp"].astype(compute_dtype),
        "emb_item_mlp": params["emb_item_mlp"].astype(compute_dtype),
        "emb_user_mf": params["emb_user_mf"].astype(compute_dtype),
        "emb_item_mf": params["emb_item_mf"].astype(compute_dtype),
        "w1": params["w1"].astype(compute_dtype),
        "w2": params["w2"].astype(compute_dtype),
        "w3": params["w3"].astype(compute_dtype),
        "consts": consts,
    }


@functools.partial(jax.jit, static_argnames=("block_rows", "vmem_limit_bytes"))
def neumf_forward(user_idx, item_idx, kparams, *, block_rows=8192,
                  vmem_limit_bytes=40 * 1024 * 1024):
    """Embedding gathers in plain JAX + one fused Pallas kernel for the math.

    Defaults (block_rows=8192, 40 MiB VMEM) are v7x-safe; on v5e/v6e raise
    block_rows to 16-32k and vmem_limit_bytes to 64-96 MiB for best throughput.
    """
    w1, w2, w3 = kparams["w1"], kparams["w2"], kparams["w3"]
    consts = kparams["consts"]
    d_mlp = kparams["emb_user_mlp"].shape[1]
    d_mf = kparams["emb_user_mf"].shape[1]
    d_in = w1.shape[0]
    assert d_in == 2 * d_mlp, "layers[0] must equal 2 * latent_dim_mlp"

    batch = user_idx.shape[0]
    block_rows = max(_ROW_ALIGN, _round_up(block_rows, _ROW_ALIGN))
    if batch <= _ROW_ALIGN:
        tb = _ROW_ALIGN
    else:
        nt = pl.cdiv(batch, block_rows)
        nt = max(nt, 2)
        nt += nt % 2  # prefer an even number of tiles -> both v7x TCs get work
        tb = min(block_rows, _round_up(pl.cdiv(batch, nt), _ROW_ALIGN))
    grid_b = pl.cdiv(batch, tb)
    b_pad = grid_b * tb

    # Pad the cheap int32 index vectors (index-0 rows are finite/benign and get
    # sliced off below) instead of jnp.pad on the gathered activations.
    if b_pad != batch:
        pad = b_pad - batch
        user_idx = jnp.pad(user_idx, (0, pad))
        item_idx = jnp.pad(item_idx, (0, pad))

    # Embedding gathers from bf16 tables, packed into one contiguous stream:
    # [user_mlp | item_mlp] feeds the MLP tower, [user_mf | item_mf] the MF path.
    act = jnp.concatenate(
        [jnp.take(kparams["emb_user_mlp"], user_idx, axis=0),
         jnp.take(kparams["emb_item_mlp"], item_idx, axis=0),
         jnp.take(kparams["emb_user_mf"], user_idx, axis=0),
         jnp.take(kparams["emb_item_mf"], item_idx, axis=0)],
        axis=-1)                                      # (b_pad, d_in + 2*d_mf) bf16

    kernel = functools.partial(
        neumf_kernel, d_in=d_in, d_mf=d_mf,
        n1=w1.shape[1], n2=w2.shape[1], n3=w3.shape[1])

    out = pl.pallas_call(
        kernel,
        grid=(grid_b,),
        out_shape=jax.ShapeDtypeStruct((1, b_pad), jnp.float32),
        in_specs=[
            # batch-tiled packed activation stream (double-buffered by Pallas)
            pl.BlockSpec((tb, act.shape[1]), lambda i: (i, 0)),
            # weights / constants: constant block index -> VMEM-resident
            pl.BlockSpec(w1.shape, lambda i: (0, 0)),
            pl.BlockSpec(w2.shape, lambda i: (0, 0)),
            pl.BlockSpec(w3.shape, lambda i: (0, 0)),
            pl.BlockSpec(consts.shape, lambda i: (0, 0)),
        ],
        # lane-dense output row per tile
        out_specs=pl.BlockSpec((1, tb), lambda i: (0, i)),
        compiler_params=pltpu.CompilerParams(
            dimension_semantics=("parallel",),
            vmem_limit_bytes=vmem_limit_bytes,
        ),
    )(act, w1, w2, w3, consts)

    # (1, b_pad) row back to the module's (batch, 1) column (cheap reshape).
    return jnp.reshape(out, (b_pad, 1))[:batch]


def init_params(key, num_users, num_items, latent_dim_mlp, latent_dim_mf, layers):
    """Deterministic parameter init mirroring the torch module's __init__."""
    assert layers[0] == 2 * latent_dim_mlp
    assert len(layers) == 4, "kernel is specialized to 3 fc layers"
    keys = jax.random.split(key, 16)
    k = iter(keys)

    def normal(kk, shape):
        return 0.01 * jax.random.normal(kk, shape, dtype=jnp.float32)

    def glorot(kk, fan_in, fan_out):   # torch stores (out, in); we keep (in, out)
        limit = np.sqrt(6.0 / (fan_in + fan_out))
        return jax.random.uniform(kk, (fan_in, fan_out), jnp.float32, -limit, limit)

    def lecun(kk, fan_in, fan_out):
        limit = np.sqrt(3.0 / fan_in)
        return jax.random.uniform(kk, (fan_in, fan_out), jnp.float32, -limit, limit)

    def bias(kk, fan_in, fan_out):     # torch Linear bias: U(-1/sqrt(fan_in), ...)
        limit = 1.0 / np.sqrt(fan_in)
        return jax.random.uniform(kk, (1, fan_out), jnp.float32, -limit, limit)

    params = {}
    params["emb_user_mlp"] = normal(next(k), (num_users, latent_dim_mlp))
    params["emb_item_mlp"] = normal(next(k), (num_items, latent_dim_mlp))
    params["emb_user_mf"] = normal(next(k), (num_users, latent_dim_mf))
    params["emb_item_mf"] = normal(next(k), (num_items, latent_dim_mf))

    params["w1"] = glorot(next(k), layers[0], layers[1])
    params["b1"] = bias(next(k), layers[0], layers[1])
    params["w2"] = glorot(next(k), layers[1], layers[2])
    params["b2"] = bias(next(k), layers[1], layers[2])
    params["w3"] = glorot(next(k), layers[2], layers[3])
    params["b3"] = bias(next(k), layers[2], layers[3])

    affine_in = layers[-1] + latent_dim_mf
    wa = lecun(next(k), affine_in, 1)
    params["wa_mlp"] = wa[:layers[-1], :]   # (layers[-1], 1)
    params["wa_mf"] = wa[layers[-1]:, :]    # (latent_dim_mf, 1)
    params["ba"] = bias(next(k), affine_in, 1)
    return params


def reference_forward(user_idx, item_idx, params):
    """Pure-JAX f32 reference (mirrors the torch forward)."""
    u_mlp = jnp.take(params["emb_user_mlp"], user_idx, axis=0)
    i_mlp = jnp.take(params["emb_item_mlp"], item_idx, axis=0)
    u_mf = jnp.take(params["emb_user_mf"], user_idx, axis=0)
    i_mf = jnp.take(params["emb_item_mf"], item_idx, axis=0)
    x = jnp.concatenate([u_mlp, i_mlp], axis=-1)
    x = jax.nn.relu(x @ params["w1"] + params["b1"])
    x = jax.nn.relu(x @ params["w2"] + params["b2"])
    x = jax.nn.relu(x @ params["w3"] + params["b3"])
    mf = u_mf * i_mf
    v = jnp.concatenate([x, mf], axis=-1)
    wa = jnp.concatenate([params["wa_mlp"], params["wa_mf"]], axis=0)
    return jax.nn.sigmoid(v @ wa + params["ba"])


if __name__ == "__main__":
    config = {
        "latent_dim_mf": 8,
        "latent_dim_mlp": 8,
        "layers": [16, 32, 16, 8],   # layers[0] == 2 * latent_dim_mlp
    }
    num_users, num_items, batch = 32, 48, 300

    key = jax.random.PRNGKey(0)
    kp, ku, ki = jax.random.split(key, 3)
    params = init_params(kp, num_users, num_items,
                         config["latent_dim_mlp"], config["latent_dim_mf"],
                         config["layers"])
    kparams = prepare_params(params)   # bf16 tables/weights + packed constants

    user_idx = jax.random.randint(ku, (batch,), 0, num_users, dtype=jnp.int32)
    item_idx = jax.random.randint(ki, (batch,), 0, num_items, dtype=jnp.int32)

    # Small block_rows so the test exercises a multi-step grid with a ragged
    # (index-padded) final batch tile.
    rating = neumf_forward(user_idx, item_idx, kparams, block_rows=128)
    rating = jax.block_until_ready(rating)

    ref = reference_forward(user_idx, item_idx, params)
    # bf16 tables + bf16 MXU path vs f32 reference -> loosened tolerance
    # (intentional approximation, see revision notes).
    np.testing.assert_allclose(np.asarray(rating), np.asarray(ref),
                               rtol=5e-2, atol=5e-3)

    assert rating.shape == (batch, 1)
    print("KERNEL_OK")
</pallas_src>

<mosaic_0001>
module attributes {stable_mosaic.version = 11 : i64} {
  func.func @neumf_kernel(%arg0: i32, %arg1: memref<128x32xbf16, #tpu.memory_space<vmem>>, %arg2: memref<16x32xbf16, #tpu.memory_space<vmem>>, %arg3: memref<32x16xbf16, #tpu.memory_space<vmem>>, %arg4: memref<16x8xbf16, #tpu.memory_space<vmem>>, %arg5: memref<8x128xf32, #tpu.memory_space<vmem>>, %arg6: memref<1x128xf32, #tpu.memory_space<vmem>>) attributes {dimension_semantics = [#tpu.dimension_semantics<parallel>], iteration_bounds = array<i64: 3>, scalar_prefetch = 0 : i64, scratch_operands = 0 : i64, tpu.core_type = #tpu.core_type<tc>, window_params = [{transform_indices = @transform_0, window_bounds = array<i64: 128, 32>}, {pipeline_mode = #tpu.pipeline_mode<synchronous>, transform_indices = @transform_1, window_bounds = array<i64: 16, 32>}, {pipeline_mode = #tpu.pipeline_mode<synchronous>, transform_indices = @transform_2, window_bounds = array<i64: 32, 16>}, {pipeline_mode = #tpu.pipeline_mode<synchronous>, transform_indices = @transform_3, window_bounds = array<i64: 16, 8>}, {pipeline_mode = #tpu.pipeline_mode<synchronous>, transform_indices = @transform_4, window_bounds = array<i64: 8, 128>}, {transform_indices = @transform_5, window_bounds = array<i64: 1, 128>}]} {
    %c0 = arith.constant 0 : index
    %c0_0 = arith.constant 0 : index
    %0 = vector.load %arg1[%c0, %c0_0] : memref<128x32xbf16, #tpu.memory_space<vmem>>, vector<128x16xbf16>
    %c0_1 = arith.constant 0 : index
    %c16 = arith.constant 16 : index
    %1 = vector.load %arg1[%c0_1, %c16] : memref<128x32xbf16, #tpu.memory_space<vmem>>, vector<128x8xbf16>
    %2 = arith.extf %1 : vector<128x8xbf16> to vector<128x8xf32>
    %c0_2 = arith.constant 0 : index
    %c24 = arith.constant 24 : index
    %3 = vector.load %arg1[%c0_2, %c24] : memref<128x32xbf16, #tpu.memory_space<vmem>>, vector<128x8xbf16>
    %4 = arith.extf %3 : vector<128x8xbf16> to vector<128x8xf32>
    %c2 = arith.constant 2 : index
    %c0_3 = arith.constant 0 : index
    %5 = vector.load %arg5[%c2, %c0_3] : memref<8x128xf32, #tpu.memory_space<vmem>>, vector<1x1xf32>
    %c3 = arith.constant 3 : index
    %c0_4 = arith.constant 0 : index
    %6 = vector.load %arg5[%c3, %c0_4] : memref<8x128xf32, #tpu.memory_space<vmem>>, vector<1x32xf32>
    %c4 = arith.constant 4 : index
    %c0_5 = arith.constant 0 : index
    %7 = vector.load %arg5[%c4, %c0_5] : memref<8x128xf32, #tpu.memory_space<vmem>>, vector<1x16xf32>
    %c5 = arith.constant 5 : index
    %c0_6 = arith.constant 0 : index
    %8 = vector.load %arg5[%c5, %c0_6] : memref<8x128xf32, #tpu.memory_space<vmem>>, vector<1x8xf32>
    %c0_7 = arith.constant 0 : index
    %c0_8 = arith.constant 0 : index
    %9 = vector.load %arg2[%c0_7, %c0_8] : memref<16x32xbf16, #tpu.memory_space<vmem>>, vector<16x32xbf16>
    %cst = arith.constant dense<0.000000e+00> : vector<128x32xf32>
    %10 = tpu.matmul %0, %9, %cst {dimension_numbers = #tpu.dot_dimension_numbers<[1], [0], [0], [1], [0, 0, 1, 1], [], []>} : vector<128x16xbf16>, vector<16x32xbf16>, vector<128x32xf32> -> vector<128x32xf32>
    %11 = vector.broadcast %6 : vector<1x32xf32> to vector<128x32xf32>
    %12 = arith.addf %10, %11 : vector<128x32xf32>
    %cst_9 = arith.constant 0.000000e+00 : f32
    %13 = vector.broadcast %cst_9 : f32 to vector<128x32xf32>
    %14 = arith.maximumf %12, %13 : vector<128x32xf32>
    %15 = arith.truncf %14 : vector<128x32xf32> to vector<128x32xbf16>
    %c0_10 = arith.constant 0 : index
    %c0_11 = arith.constant 0 : index
    %16 = vector.load %arg3[%c0_10, %c0_11] : memref<32x16xbf16, #tpu.memory_space<vmem>>, vector<32x16xbf16>
    %cst_12 = arith.constant dense<0.000000e+00> : vector<128x16xf32>
    %17 = tpu.matmul %15, %16, %cst_12 {dimension_numbers = #tpu.dot_dimension_numbers<[1], [0], [0], [1], [0, 0, 1, 1], [], []>} : vector<128x32xbf16>, vector<32x16xbf16>, vector<128x16xf32> -> vector<128x16xf32>
    %18 = vector.broadcast %7 : vector<1x16xf32> to vector<128x16xf32>
    %19 = arith.addf %17, %18 : vector<128x16xf32>
    %cst_13 = arith.constant 0.000000e+00 : f32
    %20 = vector.broadcast %cst_13 : f32 to vector<128x16xf32>
    %21 = arith.maximumf %19, %20 : vector<128x16xf32>
    %22 = arith.truncf %21 : vector<128x16xf32> to vector<128x16xbf16>
    %c0_14 = arith.constant 0 : index
    %c0_15 = arith.constant 0 : index
    %23 = vector.load %arg4[%c0_14, %c0_15] : memref<16x8xbf16, #tpu.memory_space<vmem>>, vector<16x8xbf16>
    %cst_16 = arith.constant dense<0.000000e+00> : vector<128x8xf32>
    %24 = tpu.matmul %22, %23, %cst_16 {dimension_numbers = #tpu.dot_dimension_numbers<[1], [0], [0], [1], [0, 0, 1, 1], [], []>} : vector<128x16xbf16>, vector<16x8xbf16>, vector<128x8xf32> -> vector<128x8xf32>
    %25 = vector.broadcast %8 : vector<1x8xf32> to vector<128x8xf32>
    %26 = arith.addf %24, %25 : vector<128x8xf32>
    %cst_17 = arith.constant 0.000000e+00 : f32
    %27 = vector.broadcast %cst_17 : f32 to vector<128x8xf32>
    %28 = arith.maximumf %26, %27 : vector<128x8xf32>
    %29 = arith.mulf %2, %4 : vector<128x8xf32>
    %c0_18 = arith.constant 0 : index
    %c0_19 = arith.constant 0 : index
    %30 = vector.load %arg5[%c0_18, %c0_19] : memref<8x128xf32, #tpu.memory_space<vmem>>, vector<8x8xf32>
    %31 = arith.truncf %30 : vector<8x8xf32> to vector<8x8xbf16>
    %32 = arith.truncf %28 : vector<128x8xf32> to vector<128x8xbf16>
    %cst_20 = arith.constant dense<0.000000e+00> : vector<8x128xf32>
    %33 = tpu.matmul %31, %32, %cst_20 {dimension_numbers = #tpu.dot_dimension_numbers<[1], [1], [0], [0], [0, 0, 1, 0], [], []>} : vector<8x8xbf16>, vector<128x8xbf16>, vector<8x128xf32> -> vector<8x128xf32>
    %c0_21 = arith.constant 0 : index
    %c0_22 = arith.constant 0 : index
    %34 = vector.load %arg5[%c0_21, %c0_22] : memref<8x128xf32, #tpu.memory_space<vmem>>, vector<8x8xf32>
    %35 = arith.truncf %34 : vector<8x8xf32> to vector<8x8xbf16>
    %36 = arith.truncf %29 : vector<128x8xf32> to vector<128x8xbf16>
    %cst_23 = arith.constant dense<0.000000e+00> : vector<8x128xf32>
    %37 = tpu.matmul %35, %36, %cst_23 {dimension_numbers = #tpu.dot_dimension_numbers<[1], [1], [0], [0], [0, 0, 1, 0], [], []>} : vector<8x8xbf16>, vector<128x8xbf16>, vector<8x128xf32> -> vector<8x128xf32>
    %38 = vector.extract_strided_slice %33 {offsets = [0, 0], sizes = [1, 128], strides = [1, 1]} : vector<8x128xf32> to vector<1x128xf32>
    %39 = vector.extract_strided_slice %37 {offsets = [1, 0], sizes = [1, 128], strides = [1, 1]} : vector<8x128xf32> to vector<1x128xf32>
    %40 = arith.addf %38, %39 : vector<1x128xf32>
    %41 = vector.broadcast %5 : vector<1x1xf32> to vector<1x128xf32>
    %42 = arith.addf %40, %41 : vector<1x128xf32>
    %43 = arith.negf %42 : vector<1x128xf32>
    %44 = math.exp %43 : vector<1x128xf32>
    %cst_24 = arith.constant 1.000000e+00 : f32
    %45 = vector.broadcast %cst_24 : f32 to vector<1x128xf32>
    %46 = arith.addf %45, %44 : vector<1x128xf32>
    %47 = arith.divf %45, %46 : vector<1x128xf32>
    %c0_25 = arith.constant 0 : index
    %c0_26 = arith.constant 0 : index
    %48 = vector.load %arg6[%c0_25, %c0_26] : memref<1x128xf32, #tpu.memory_space<vmem>>, vector<1x128xf32>
    tpu.vector_store %arg6[%c0_25, %c0_26], %47 {strides = array<i32>} : memref<1x128xf32, #tpu.memory_space<vmem>>, vector<1x128xf32>,
    return
  }
  func.func @transform_0(%arg0: i32) -> (i32, i32) {
    %c0_i32 = arith.constant 0 : i32
    %c0_i32_0 = arith.constant 0 : i32
    return %arg0, %c0_i32 : i32, i32
  }
  func.func @transform_1(%arg0: i32) -> (i32, i32) {
    %c0_i32 = arith.constant 0 : i32
    %c0_i32_0 = arith.constant 0 : i32
    %c0_i32_1 = arith.constant 0 : i32
    return %c0_i32, %c0_i32_0 : i32, i32
  }
  func.func @transform_2(%arg0: i32) -> (i32, i32) {
    %c0_i32 = arith.constant 0 : i32
    %c0_i32_0 = arith.constant 0 : i32
    %c0_i32_1 = arith.constant 0 : i32
    return %c0_i32, %c0_i32_0 : i32, i32
  }
  func.func @transform_3(%arg0: i32) -> (i32, i32) {
    %c0_i32 = arith.constant 0 : i32
    %c0_i32_0 = arith.constant 0 : i32
    %c0_i32_1 = arith.constant 0 : i32
    return %c0_i32, %c0_i32_0 : i32, i32
  }
  func.func @transform_4(%arg0: i32) -> (i32, i32) {
    %c0_i32 = arith.constant 0 : i32
    %c0_i32_0 = arith.constant 0 : i32
    %c0_i32_1 = arith.constant 0 : i32
    return %c0_i32, %c0_i32_0 : i32, i32
  }
  func.func @transform_5(%arg0: i32) -> (i32, i32) {
    %c0_i32 = arith.constant 0 : i32
    %c0_i32_0 = arith.constant 0 : i32
    return %c0_i32, %arg0 : i32, i32
  }
}

</mosaic_0001>

<bundles_post_ra>
// kernel: neumf_forward.1
= control target key start
LH: loop header
LB: loop body
LE: loop exit
PB: predicated region body
PF: predicated region fallthrough
CT: control target
= control target key end

     0   :  { %s1407_s18 = smov 0   ;;  %s1642_s0 = inlined_call_operand.vmem [shape: bf16[384,32], index: 0, kind: input, shape index: {}]   ;;  %s1643_s1 = inlined_call_operand.vmem [shape: bf16[16,32], index: 1, kind: input, shape index: {}]   ;;  %s1644_s2 = inlined_call_operand.vmem [shape: bf16[32,16], index: 2, kind: input, shape index: {}]   ;;  %s1645_s3 = inlined_call_operand.vmem [shape: bf16[16,8], index: 3, kind: input, shape index: {}]   ;;  %s1646_s4 = inlined_call_operand.vmem [shape: f32[8,128], index: 4, kind: input, shape index: {}]   ;;  %s1647_s5 = inlined_call_operand.vmem [shape: f32[1,384], index: 5, kind: output, shape index: {}]  }
   0x1 LB: > { %s1413_s19 = sadd.s32 4294967295, %s1370_s18   ;;  %p1095_p0 = scmp.ge.s32.totalorder %s1370_s18, 1  ;;  %s1370_s18 = sphi %s1407_s18, %s15_s18  }
   0x2   : > { %p188_p1 = scmp.lt.s32.totalorder %s1370_s18, 4 }
   0x4   : > { %p189_p2 = pnand %p1095_p0, %p188_p1 }
   0x5   : > { %v1340_v0 = vld [vmem:[%s1643_s1] sm:$0xff] (!%p189_p2)   ;;  %s1096_s22 = sshll.u32 (!%p189_p2), %s1413_s19, 4  ;;  %vm312_vm0 = vcmask (!%p189_p2), 130048   ;;  %v1350_v10 = vld [vmem:[%s1644_s2 + $0x8] sm:$0xff] (!%p189_p2)   ;;  %s1372_s8 = smov (!%p189_p2), 120   ;;  %vm478_vm1 = vcmask (!%p189_p2), 261120  }
   0x6   : > { %192 = sbr.rel (%p189_p2) target bundleno = 990 (0x3de), region = 40  ;;  %p215_p3 = scmp.lt.s32.totalorder (!%p189_p2), %s1096_s22, 47  ;;  %1188 = vmatprep.subr.bf16.mxu0 (!%p189_p2), %v1340_v0  ;;  %1284 = vmatprep.subr.bf16.mxu1 (!%p189_p2), %v1340_v0  ;;  %v1349_v1 = vld [vmem:[%s1644_s2] sm:$0xff] (!%p189_p2)   ;;  %vm863_vm2 = vcmask (!%p189_p2), 64512   ;;  %vm1375_vm3 = vmmov (!%p189_p2), 0  }
   0x7   : > { %1189 = vmatpush3.bf16.msra.mxu0 (!%p189_p2), %v1340_v0  ;;  %1285 = vmatpush3.bf16.msra.mxu1 (!%p189_p2), %v1340_v0  ;;  %v1351_v13 = vld [vmem:[%s1645_s3] sm:$0xff] (!%p189_p2)   ;;  %s1373_s11 = smov (!%p189_p2), 112   ;;  %p220_p4 = scmp.lt.s32.totalorder (!%p189_p2), %s1413_s19, 2 }
   0x8   : > { %1206 = vmatprep.subr.bf16.mxu1 (!%p189_p2), %v1349_v1  ;;  %1226 = vmatprep.subr.bf16.mxu0 (!%p189_p2), %v1351_v13  ;;  %v1098_v18 = vld [vmem:[%s1646_s4 + $0x3] ss:$0 sm:$0xff] (!%p189_p2) }
   0xd   : > { %s1649_s22 = smov (!%p215_p3, %s1096_s22), 47  ;;  %s1651_s19 = smov (!%p220_p4, %s1413_s19), 2 }
   0xe   : > { %s1097_s25 = sshll.u32 %s1649_s22, 2  ;;  %s222_s24 = scalar_lea.vmem %s1647_s5, %s1651_s19 }
   0xf   : > { %s218_s28 = scalar_lea.vmem %s1642_s0, %s1097_s25 }
  0x10   : > { %v1427_v2 = vld [vmem:[%s218_s28] sm:$0xff]   ;;  %v1429_v3 = vld [vmem:[%s218_s28 + $0x8] sm:$0xff]   ;;  %v1431_v4 = vld [vmem:[%s218_s28 + $0x10] sm:$0xff]  }
  0x11   : > { %v1433_v5 = vld [vmem:[%s218_s28 + $0x20] sm:$0xff]   ;;  %v1435_v6 = vld [vmem:[%s218_s28 + $0x28] sm:$0xff]   ;;  %v1437_v7 = vld [vmem:[%s218_s28 + $0x30] sm:$0xff]   ;;  %1190 = vmatprep.mubr.msk.bf16.mxu0 %vm312_vm0, %v1427_v2  ;;  %v240_v11 = vunpack.c.l.bf16 %v1427_v2  ;;  %v241_v12 = vunpack.c.h.bf16 %v1427_v2  ;;  %v242_v14 = vunpack.c.l.bf16 %v1429_v3  ;;  %v243_v15 = vunpack.c.h.bf16 %v1429_v3 }
  0x12   : > { %1191 = vmatmul.mubr.msk.bf16.vlgmr.msra.gmra.mrb[0].mxu0 %vm312_vm0, %v1429_v3  ;;  %1198 = vmatprep.mubr.msk.bf16.mxu1 %vm312_vm0, %v1433_v5  ;;  %v1447_v8 = vld [vmem:[%s218_s28 + $0x18] sm:$0xff]  }
  0x13   : > { %1194 = vmatprep.mubr.msk.bf16.mxu0 %vm312_vm0, %v1431_v4  ;;  %1199 = vmatmul.mubr.msk.bf16.vlgmr.msra.gmra.mrb[0].mxu1 %vm312_vm0, %v1435_v6  ;;  %v1453_v9 = vld [vmem:[%s218_s28 + $0x38] sm:$0xff]   ;;  %v1299_v16 = vpack.i.bf16 %v241_v12, %v240_v11  ;;  %v1304_v17 = vpack.i.bf16 %v243_v15, %v242_v14 }
  0x14   : > { %1202 = vmatprep.mubr.msk.bf16.mxu1 %vm312_vm0, %v1437_v7  ;;  %1207 = vmatpush3.bf16.msra.mxu1 %v1349_v1 }
  0x15   : > { %1208 = vmatprep.subr.bf16.mxu1 %v1350_v10  ;;  %1227 = vmatpush3.bf16.msra.mxu0 %v1351_v13 }
  0x16   : > { %1300 = vrot.lane.b32.xlu0 %v1299_v16, %s1372_s8 }
  0x18   : > { %1209 = vmatpush3.bf16.msra.mxu1 %v1350_v10 }
  0x1a   : > { %1195 = vmatmul.mubr.msk.bf16.gmra.mrb[4].mxu0 %vm312_vm0, %v1447_v8  ;;  %1305 = vrot.lane.b32.xlu0 %v1304_v17, %s1372_s8 }
  0x1b   : > { %1203 = vmatmul.mubr.msk.bf16.gmra.mrb[4].mxu1 %vm312_vm0, %v1453_v9 }
  0xe5   : > { %v1192_v19 = vpop.f32.mrb[0].mxu0 }
  0xe6   : > { %v380_v20 = vadd.f32 %v1192_v19, %v1098_v18  ;;  %v371_v21 = vpop.f32.mrb[1].mxu0  ;;  %v1200_v22 = vpop.f32.mrb[0].mxu1 }
  0xe7   : > { %v372_v23 = vadd.f32 %v1098_v18, %v371_v21  ;;  %v1193_v24 = vpop.f32.mrb[2].mxu0  ;;  %v412_v25 = vadd.f32 %v1200_v22, %v1098_v18  ;;  %v403_v26 = vpop.f32.mrb[1].mxu1 }
  0xe8   : > { %v383_v27 = vadd.f32 %v1193_v24, %v1098_v18  ;;  %v374_v28 = vpop.f32.mrb[3].mxu0  ;;  %v404_v29 = vadd.f32 %v1098_v18, %v403_v26  ;;  %v1201_v30 = vpop.f32.mrb[2].mxu1  ;;  %v436_v35 = vmax.f32 %v380_v20, 0.0  ;;  %v245_v24 = vunpack.c.h.bf16 %v1431_v4 }
  0xe9   : > { %v375_v31 = vadd.f32 %v1098_v18, %v374_v28  ;;  %v444_v32 = vmax.f32 %v412_v25, 0.0  ;;  %v415_v33 = vadd.f32 %v1201_v30, %v1098_v18  ;;  %v406_v34 = vpop.f32.mrb[3].mxu1  ;;  %v434_v39 = vmax.f32 %v372_v23, 0.0 }
  0xea   : > { %v437_v36 = vmax.f32 %v383_v27, 0.0  ;;  %v442_v37 = vmax.f32 %v404_v29, 0.0  ;;  %v407_v38 = vadd.f32 %v1098_v18, %v406_v34  ;;  %v246_v26 = vunpack.c.l.bf16 %v1447_v8 }
  0xeb   : > { %v435_v40 = vmax.f32 %v375_v31, 0.0  ;;  %v445_v41 = vmax.f32 %v415_v33, 0.0  ;;  %v247_v27 = vunpack.c.h.bf16 %v1447_v8  ;;  %v248_v29 = vunpack.c.l.bf16 %v1433_v5 }
  0xec   : > { %v451_v42 = vpack.c.bf16 %v437_v36, %v436_v35  ;;  %v443_v43 = vmax.f32 %v407_v38, 0.0  ;;  %v249_v30 = vunpack.c.h.bf16 %v1433_v5  ;;  %v252_v33 = vunpack.c.l.bf16 %v1437_v7 }
  0xed   : > { %v450_v44 = vpack.c.bf16 %v435_v40, %v434_v39  ;;  %v1196_v45 = vpop.f32.mrb[4].mxu0  ;;  %v455_v46 = vpack.c.bf16 %v445_v41, %v444_v32  ;;  %v1314_v28 = vpack.i.bf16 %v247_v27, %v246_v26  ;;  %v251_v32 = vunpack.c.h.bf16 %v1435_v6  ;;  %v1301_v39 = vpop.permute.xlu0 %1300 }
  0xee   : > { %v396_v47 = vadd.f32 %v1196_v45, %v1098_v18  ;;  %v387_v48 = vpop.f32.mrb[5].mxu0  ;;  %v454_v49 = vpack.c.bf16 %v443_v43, %v442_v37  ;;  %v1204_v50 = vpop.f32.mrb[4].mxu1  ;;  %v1319_v31 = vpack.i.bf16 %v249_v30, %v248_v29  ;;  %v253_v34 = vunpack.c.h.bf16 %v1437_v7 }
  0xef   : > { %v388_v51 = vadd.f32 %v1098_v18, %v387_v48  ;;  %v1197_v52 = vpop.f32.mrb[6].mxu0  ;;  %1210 = vmatprep.mubr.msk.bf16.mxu1 %vm478_vm1, %v450_v44  ;;  %v428_v53 = vadd.f32 %v1204_v50, %v1098_v18  ;;  %v419_v54 = vpop.f32.mrb[5].mxu1  ;;  %v254_v35 = vunpack.c.l.bf16 %v1453_v9  ;;  %v255_v36 = vunpack.c.h.bf16 %v1453_v9 }
  0xf0   : > { %v440_v55 = vmax.f32 %v396_v47, 0.0  ;;  %v399_v56 = vadd.f32 %v1197_v52, %v1098_v18  ;;  %v390_v57 = vpop.f32.mrb[7].mxu0  ;;  %1211 = vmatmul.mubr.msk.bf16.vlgmr.msra.gmra.mrb[8].mxu1 %vm478_vm1, %v451_v42  ;;  %v420_v58 = vadd.f32 %v1098_v18, %v419_v54  ;;  %v1205_v59 = vpop.f32.mrb[6].mxu1  ;;  %1320 = vrot.lane.b32.xlu0 %v1319_v31, %s1372_s8  ;;  %v1329_v37 = vpack.i.bf16 %v253_v34, %v252_v33 }
  0xf1   : > { %v438_v60 = vmax.f32 %v388_v51, 0.0  ;;  %v391_v61 = vadd.f32 %v1098_v18, %v390_v57  ;;  %v448_v62 = vmax.f32 %v428_v53, 0.0  ;;  %v431_v63 = vadd.f32 %v1205_v59, %v1098_v18  ;;  %v422_v0 = vpop.f32.mrb[7].mxu1  ;;  %v1306_v44 = vpop.permute.xlu0 %1305  ;;  %v1537_v53 = vld [vmem:[%s1646_s4 + $0x4] ss:$0 sm:$0xff] }
  0xf2   : > { %v441_v1 = vmax.f32 %v399_v56, 0.0  ;;  %v446_v10 = vmax.f32 %v420_v58, 0.0  ;;  %v423_v13 = vadd.f32 %v1098_v18, %v422_v0  ;;  %v244_v18 = vunpack.c.l.bf16 %v1431_v4 }
  0xf3   : > { %v439_v16 = vmax.f32 %v391_v61, 0.0  ;;  %v449_v17 = vmax.f32 %v431_v63, 0.0  ;;  %v250_v4 = vunpack.c.l.bf16 %v1435_v6  ;;  %v1334_v38 = vpack.i.bf16 %v255_v36, %v254_v35 }
  0xf4   : > { %v453_v19 = vpack.c.bf16 %v441_v1, %v440_v55  ;;  %v447_v20 = vmax.f32 %v423_v13, 0.0  ;;  %v1309_v25 = vpack.i.bf16 %v245_v24, %v244_v18  ;;  %1330 = vrot.lane.b32.xlu0 %v1329_v37, %s1372_s8  ;;  %v1303_v40 = vunpack.i.h.bf16 %v1301_v39 }
  0xf5   : > { %v452_v21 = vpack.c.bf16 %v439_v16, %v438_v60  ;;  %v457_v22 = vpack.c.bf16 %v449_v17, %v448_v62  ;;  %v1324_v8 = vpack.i.bf16 %v251_v32, %v250_v4  ;;  %v1302_v41 = vunpack.i.l.bf16 %v1301_v39 }
  0xf6   : > { %v456_v23 = vpack.c.bf16 %v447_v20, %v446_v10  ;;  %1310 = vrot.lane.b32.xlu1 %v1309_v25, %s1372_s8  ;;  %v838_v42 = vmul.f32 %v1303_v40, %v241_v12  ;;  %v1307_v47 = vunpack.i.l.bf16 %v1306_v44 }
  0xf7   : > { %1214 = vmatprep.mubr.msk.bf16.mxu1 %vm478_vm1, %v452_v21  ;;  %v837_v43 = vmul.f32 %v1302_v41, %v240_v11 }
  0xf8   : > { %1215 = vmatmul.mubr.msk.bf16.gmra.mrb[12].mxu1 %vm478_vm1, %v453_v19 }
  0xf9   : > { %1218 = vmatprep.mubr.msk.bf16.mxu1 %vm478_vm1, %v454_v49  ;;  %v931_v45 = vpack.c.bf16 %v838_v42, %v837_v43  ;;  %v839_v49 = vmul.f32 %v1307_v47, %v242_v14 }
  0xfa   : > { %1315 = vrot.lane.b32.xlu1 %v1314_v28, %s1372_s8 }
  0xfb   : > { %947 = vrot.lane.b32.xlu0 %v931_v45, %s1373_s11 }
  0xfe   : > { %1325 = vrot.lane.b32.xlu1 %v1324_v8, %s1372_s8 }
 0x100   : > { %1219 = vmatmul.mubr.msk.bf16.gmra.mrb[16].mxu1 %vm478_vm1, %v455_v46  ;;  %v1308_v46 = vunpack.i.h.bf16 %v1306_v44 }
 0x101   : > { %1222 = vmatprep.mubr.msk.bf16.mxu1 %vm478_vm1, %v456_v23 }
 0x102   : > { %1335 = vrot.lane.b32.xlu1 %v1334_v38, %s1372_s8  ;;  %v840_v48 = vmul.f32 %v1308_v46, %v243_v15 }
 0x104   : > { %v932_v50 = vpack.c.bf16 %v840_v48, %v839_v49 }
 0x106   : > { %949 = vrot.lane.b32.xlu1 %v932_v50, %s1373_s11 }
 0x108   : > { %1223 = vmatmul.mubr.msk.bf16.gmra.mrb[20].mxu1 %vm478_vm1, %v457_v22 }
 0x168   : > { %v1311_v12 = vpop.permute.xlu1 %1310 }
 0x169   : > { %v1313_v51 = vunpack.i.h.bf16 %v1311_v12  ;;  %v1312_v2 = vunpack.i.l.bf16 %v1311_v12 }
 0x16b   : > { %v842_v11 = vmul.f32 %v1313_v51, %v245_v24  ;;  %v841_v52 = vmul.f32 %v1312_v2, %v244_v18  ;;  %v1321_v18 = vpop.permute.xlu0 %1320 }
 0x16c   : > { %v1316_v15 = vpop.permute.xlu1 %1315 }
 0x16d   : > { %v933_v54 = vpack.c.bf16 %v842_v11, %v841_v52  ;;  %v1318_v58 = vunpack.i.h.bf16 %v1316_v15  ;;  %v1317_v59 = vunpack.i.l.bf16 %v1316_v15 }
 0x16f   : > { %951 = vrot.lane.b32.xlu0 %v933_v54, %s1373_s11  ;;  %v844_v63 = vmul.f32 %v1318_v58, %v247_v27  ;;  %v843_v0 = vmul.f32 %v1317_v59, %v246_v26  ;;  %v1323_v26 = vunpack.i.h.bf16 %v1321_v18  ;;  %v1322_v27 = vunpack.i.l.bf16 %v1321_v18  ;;  %v1331_v6 = vpop.permute.xlu0 %1330 }
 0x170   : > { %v1326_v44 = vpop.permute.xlu1 %1325  ;;  %v1332_v15 = vunpack.i.l.bf16 %v1331_v6 }
 0x171   : > { %v934_v17 = vpack.c.bf16 %v844_v63, %v843_v0  ;;  %v846_v39 = vmul.f32 %v1323_v26, %v249_v30  ;;  %v845_v40 = vmul.f32 %v1322_v27, %v248_v29  ;;  %v1328_v46 = vunpack.i.h.bf16 %v1326_v44 }
 0x172   : > { %v1327_v47 = vunpack.i.l.bf16 %v1326_v44  ;;  %v849_v63 = vmul.f32 %v1332_v15, %v252_v33 }
 0x173   : > { %953 = vrot.lane.b32.xlu1 %v934_v17, %s1373_s11  ;;  %v935_v43 = vpack.c.bf16 %v846_v39, %v845_v40  ;;  %v848_v30 = vmul.f32 %v1328_v46, %v251_v32  ;;  %v1333_v32 = vunpack.i.h.bf16 %v1331_v6  ;;  %v948_v18 = vpop.permute.xlu0 %947 }
 0x174   : > { %v847_v5 = vmul.f32 %v1327_v47, %v250_v4  ;;  %v256_v47 = vld [vmem:[%s1646_s4 + $0x2] sm:$0x1] }
 0x175   : > { %955 = vrot.lane.b32.xlu0 %v935_v43, %s1373_s11 }
 0x176   : > { %v936_v54 = vpack.c.bf16 %v848_v30, %v847_v5 }
 0x178   : > { %957 = vrot.lane.b32.xlu1 %v936_v54, %s1373_s11 }
 0x1c3   : > { %v1212_v55 = vpop.f32.mrb[8].mxu1 }
 0x1c4   : > { %v546_v3 = vadd.f32 %v1212_v55, %v1537_v53  ;;  %v537_v14 = vpop.f32.mrb[9].mxu1 }
 0x1c5   : > { %v538_v56 = vadd.f32 %v1537_v53, %v537_v14  ;;  %v1213_v57 = vpop.f32.mrb[10].mxu1 }
 0x1c6   : > { %v549_v60 = vadd.f32 %v1213_v57, %v1537_v53  ;;  %v540_v61 = vpop.f32.mrb[11].mxu1  ;;  %v602_v1 = vmax.f32 %v546_v3, 0.0 }
 0x1c7   : > { %v541_v62 = vadd.f32 %v1537_v53, %v540_v61  ;;  %v600_v13 = vmax.f32 %v538_v56, 0.0  ;;  %v1336_v56 = vpop.permute.xlu1 %1335 }
 0x1c8   : > { %v603_v10 = vmax.f32 %v549_v60, 0.0  ;;  %v1338_v58 = vunpack.i.h.bf16 %v1336_v56  ;;  %v1337_v59 = vunpack.i.l.bf16 %v1336_v56 }
 0x1c9   : > { %v601_v16 = vmax.f32 %v541_v62, 0.0  ;;  %v850_v62 = vmul.f32 %v1333_v32, %v253_v34 }
 0x1ca   : > { %v617_v19 = vpack.c.bf16 %v603_v10, %v602_v1  ;;  %v852_v10 = vmul.f32 %v1338_v58, %v255_v36 }
 0x1cb   : > { %v616_v20 = vpack.c.bf16 %v601_v16, %v600_v13  ;;  %v1216_v21 = vpop.f32.mrb[12].mxu1  ;;  %v851_v13 = vmul.f32 %v1337_v59, %v254_v35 }
 0x1cc   : > { %v562_v22 = vadd.f32 %v1216_v21, %v1537_v53  ;;  %v553_v23 = vpop.f32.mrb[13].mxu1 }
 0x1cd   : > { %v554_v24 = vadd.f32 %v1537_v53, %v553_v23  ;;  %v1217_v25 = vpop.f32.mrb[14].mxu1  ;;  %1228 = vmatprep.mubr.msk.bf16.mxu0 %vm312_vm0, %v616_v20  ;;  %v938_v20 = vpack.c.bf16 %v852_v10, %v851_v13 }
 0x1ce   : > { %v606_v28 = vmax.f32 %v562_v22, 0.0  ;;  %v565_v31 = vadd.f32 %v1217_v25, %v1537_v53  ;;  %v556_v8 = vpop.f32.mrb[15].mxu1  ;;  %1229 = vmatmul.mubr.msk.bf16.vlgmr.msra.gmra.mrb[8].mxu0 %vm312_vm0, %v617_v19  ;;  %v937_v19 = vpack.c.bf16 %v850_v62, %v849_v63  ;;  %v1374_v25 = vmov 0.0  }
 0x1cf   : > { %v604_v37 = vmax.f32 %v554_v24, 0.0  ;;  %v557_v38 = vadd.f32 %v1537_v53, %v556_v8  ;;  %961 = vrot.lane.b32.xlu1 %v938_v20, %s1373_s11  ;;  %v964_v24 = vsel %vm863_vm2, %v948_v18, 0  ;;  %1264 = vmatprep.subr.bf16.mxu0 %v1374_v25 }
 0x1d0   : > { %v607_v41 = vmax.f32 %v565_v31, 0.0  ;;  %959 = vrot.lane.b32.xlu0 %v937_v19, %s1373_s11  ;;  %1244 = vmatprep.subr.bf16.mxu1 %v1374_v25 }
 0x1d1   : > { %v605_v42 = vmax.f32 %v557_v38, 0.0  ;;  %1265 = vmatpush3.bf16.xpose.msra.mxu0 %v964_v24  ;;  %1260 = vmatprep.mubr.msk.bf16.mxu1 %vm1375_vm3, %v1374_v25 }
 0x1d2   : > { %v619_v45 = vpack.c.bf16 %v607_v41, %v606_v28  ;;  %1266 = vmatprep.subr.bf16.mxu0 %v1374_v25 }
 0x1d3   : > { %v618_v48 = vpack.c.bf16 %v605_v42, %v604_v37  ;;  %v1220_v49 = vpop.f32.mrb[16].mxu1 }
 0x1d4   : > { %v578_v50 = vadd.f32 %v1220_v49, %v1537_v53  ;;  %v569_v12 = vpop.f32.mrb[17].mxu1  ;;  %v1127_v49 = vld [vmem:[%s1646_s4 + $0x5] ss:$0 sm:$0xff] }
 0x1d5   : > { %1232 = vmatprep.mubr.msk.bf16.mxu0 %vm312_vm0, %v618_v48  ;;  %v570_v29 = vadd.f32 %v1537_v53, %v569_v12  ;;  %v1221_v51 = vpop.f32.mrb[18].mxu1  ;;  %v1376_v48 = vmov 0  }
 0x1d6   : > { %1233 = vmatmul.mubr.msk.bf16.gmra.mrb[12].mxu0 %vm312_vm0, %v619_v45  ;;  %v610_v2 = vmax.f32 %v578_v50, 0.0  ;;  %v581_v11 = vadd.f32 %v1221_v51, %v1537_v53  ;;  %v572_v52 = vpop.f32.mrb[19].mxu1  ;;  %v853_v45 = vld [vmem:[%s1646_s4] sm:$0xff]  ;;  %1339 = vset.pattern.permute.xlu0 %v1376_v48 }
 0x1d7   : > { %v608_v55 = vmax.f32 %v570_v29, 0.0  ;;  %v573_v3 = vadd.f32 %v1537_v53, %v572_v52  ;;  %v1605_v46 = vpack.c.bf16 %v853_v45, %v853_v45  ;;  %1033 = vperm.xlu0 %1339, %v256_v47  }
 0x1d8   : > { %v611_v14 = vmax.f32 %v581_v11, 0.0 }
 0x1d9   : > { %v609_v4 = vmax.f32 %v573_v3, 0.0 }
 0x1da   : > { %v621_v57 = vpack.c.bf16 %v611_v14, %v610_v2 }
 0x1db   : > { %v620_v60 = vpack.c.bf16 %v609_v4, %v608_v55  ;;  %v1224_v61 = vpop.f32.mrb[20].mxu1 }
 0x1dc   : > { %v594_v0 = vadd.f32 %v1224_v61, %v1537_v53  ;;  %v585_v1 = vpop.f32.mrb[21].mxu1 }
 0x1dd   : > { %1236 = vmatprep.mubr.msk.bf16.mxu0 %vm312_vm0, %v620_v60  ;;  %v586_v16 = vadd.f32 %v1537_v53, %v585_v1  ;;  %v1225_v17 = vpop.f32.mrb[22].mxu1 }
 0x1de   : > { %1237 = vmatmul.mubr.msk.bf16.gmra.mrb[16].mxu0 %vm312_vm0, %v621_v57  ;;  %v614_v34 = vmax.f32 %v594_v0, 0.0  ;;  %v597_v7 = vadd.f32 %v1225_v17, %v1537_v53  ;;  %v588_v33 = vpop.f32.mrb[23].mxu1 }
 0x1df   : > { %v612_v21 = vmax.f32 %v586_v16, 0.0  ;;  %v589_v22 = vadd.f32 %v1537_v53, %v588_v33  ;;  %v950_v53 = vpop.permute.xlu1 %949 }
 0x1e0   : > { %v615_v9 = vmax.f32 %v597_v7, 0.0  ;;  %v967_v26 = vsel %vm863_vm2, %v950_v53, 0 }
 0x1e1   : > { %v613_v35 = vmax.f32 %v589_v22, 0.0  ;;  %1267 = vmatpush3.bf16.xpose.msra.mxu0 %v967_v26  ;;  %v952_v27 = vpop.permute.xlu0 %951 }
 0x1e2   : > { %v623_v36 = vpack.c.bf16 %v615_v9, %v614_v34  ;;  %1268 = vmatprep.subr.bf16.mxu0 %v1374_v25  ;;  %v970_v28 = vsel %vm863_vm2, %v952_v27, 0 }
 0x1e3   : > { %v622_v23 = vpack.c.bf16 %v613_v35, %v612_v21 }
 0x1e5   : > { %1240 = vmatprep.mubr.msk.bf16.mxu0 %vm312_vm0, %v622_v23  ;;  %v954_v31 = vpop.permute.xlu1 %953 }
 0x1e6   : > { %1241 = vmatmul.mubr.msk.bf16.gmra.mrb[20].mxu0 %vm312_vm0, %v623_v36  ;;  %v973_v8 = vsel %vm863_vm2, %v954_v31, 0 }
 0x1e7   : > { %v956_v37 = vpop.permute.xlu0 %955  ;;  %1280 = vmatprep.mubr.msk.bf16.mxu0 %vm1375_vm3, %v1374_v25 }
 0x1e8   : > { %v976_v38 = vsel %vm863_vm2, %v956_v37, 0 }
 0x1e9   : > { %1269 = vmatpush3.bf16.xpose.msra.mxu0 %v970_v28 }
 0x1ea   : > { %1270 = vmatprep.subr.bf16.mxu0 %v1374_v25  ;;  %v958_v39 = vpop.permute.xlu1 %957 }
 0x1eb   : > { %v979_v40 = vsel %vm863_vm2, %v958_v39, 0 }
 0x1f1   : > { %1271 = vmatpush3.bf16.xpose.msra.mxu0 %v973_v8 }
 0x1f2   : > { %1272 = vmatprep.subr.bf16.mxu0 %v1374_v25 }
 0x1f9   : > { %1273 = vmatpush3.bf16.xpose.msra.mxu0 %v976_v38 }
 0x1fa   : > { %1274 = vmatprep.subr.bf16.mxu0 %v1374_v25 }
 0x201   : > { %1275 = vmatpush3.bf16.xpose.msra.mxu0 %v979_v40 }
 0x202   : > { %1276 = vmatprep.subr.bf16.mxu0 %v1374_v25 }
 0x241   : > { %v962_v43 = vpop.permute.xlu1 %961 }
 0x242   : > { %v960_v41 = vpop.permute.xlu0 %959  ;;  %v985_v44 = vsel %vm863_vm2, %v962_v43, 0 }
 0x243   : > { %v982_v42 = vsel %vm863_vm2, %v960_v41, 0 }
 0x244   : > { %1277 = vmatpush3.bf16.xpose.msra.mxu0 %v982_v42 }
 0x245   : > { %1278 = vmatprep.subr.bf16.mxu0 %v1374_v25 }
 0x24c   : > { %1279 = vmatpush3.bf16.xpose.msra.mxu0 %v985_v44 }
 0x253   : > { %1281 = vmatmul.mubr.msk.bf16.vlgmr.msra.gmra.mrb[24].mxu0 %vm863_vm2, %v1605_v46 }
 0x2a1   : > { %v1230_v50 = vpop.f32.mrb[8].mxu0 }
 0x2a2   : > { %v703_v12 = vadd.f32 %v1230_v50, %v1127_v49  ;;  %v694_v30 = vpop.f32.mrb[9].mxu0 }
 0x2a3   : > { %v695_v5 = vadd.f32 %v1127_v49, %v694_v30  ;;  %v1231_v29 = vpop.f32.mrb[10].mxu0 }
 0x2a4   : > { %v706_v51 = vadd.f32 %v1231_v29, %v1127_v49  ;;  %v697_v2 = vpop.f32.mrb[11].mxu0  ;;  %v759_v52 = vmax.f32 %v703_v12, 0.0 }
 0x2a5   : > { %v698_v11 = vadd.f32 %v1127_v49, %v697_v2  ;;  %v757_v55 = vmax.f32 %v695_v5, 0.0 }
 0x2a6   : > { %v760_v54 = vmax.f32 %v706_v51, 0.0 }
 0x2a7   : > { %v758_v3 = vmax.f32 %v698_v11, 0.0 }
 0x2a8   : > { %v856_v14 = vpack.c.bf16 %v760_v54, %v759_v52  ;;  %v1034_v52 = vpop.permute.xlu0 %1033 }
 0x2a9   : > { %v855_v6 = vpack.c.bf16 %v758_v3, %v757_v55  ;;  %v1234_v4 = vpop.f32.mrb[12].mxu0 }
 0x2aa   : > { %v719_v32 = vadd.f32 %v1234_v4, %v1127_v49  ;;  %v710_v15 = vpop.f32.mrb[13].mxu0  ;;  %v871_v34 = vsel %vm863_vm2, %v856_v14, 0 }
 0x2ab   : > { %v711_v56 = vadd.f32 %v1127_v49, %v710_v15  ;;  %v1235_v57 = vpop.f32.mrb[14].mxu0  ;;  %v868_v58 = vsel %vm863_vm2, %v855_v6, 0 }
 0x2ac   : > { %v722_v59 = vadd.f32 %v1235_v57, %v1127_v49  ;;  %v713_v60 = vpop.f32.mrb[15].mxu0  ;;  %1245 = vmatpush3.bf16.xpose.msra.mxu1 %v868_v58  ;;  %v763_v62 = vmax.f32 %v719_v32, 0.0 }
 0x2ad   : > { %v714_v61 = vadd.f32 %v1127_v49, %v713_v60  ;;  %1246 = vmatprep.subr.bf16.mxu1 %v1374_v25  ;;  %v761_v0 = vmax.f32 %v711_v56, 0.0 }
 0x2ae   : > { %v764_v63 = vmax.f32 %v722_v59, 0.0 }
 0x2af   : > { %v762_v1 = vmax.f32 %v714_v61, 0.0 }
 0x2b0   : > { %v858_v10 = vpack.c.bf16 %v764_v63, %v763_v62 }
 0x2b1   : > { %v857_v13 = vpack.c.bf16 %v762_v1, %v761_v0  ;;  %v1238_v16 = vpop.f32.mrb[16].mxu0 }
 0x2b2   : > { %v735_v17 = vadd.f32 %v1238_v16, %v1127_v49  ;;  %v726_v19 = vpop.f32.mrb[17].mxu0  ;;  %v877_v47 = vsel %vm863_vm2, %v858_v10, 0 }
 0x2b3   : > { %v727_v7 = vadd.f32 %v1127_v49, %v726_v19  ;;  %v1239_v33 = vpop.f32.mrb[18].mxu0  ;;  %v874_v28 = vsel %vm863_vm2, %v857_v13, 0 }
 0x2b4   : > { %1247 = vmatpush3.bf16.xpose.msra.mxu1 %v871_v34  ;;  %v767_v20 = vmax.f32 %v735_v17, 0.0  ;;  %v738_v21 = vadd.f32 %v1239_v33, %v1127_v49  ;;  %v729_v22 = vpop.f32.mrb[19].mxu0 }
 0x2b5   : > { %v765_v9 = vmax.f32 %v727_v7, 0.0  ;;  %v730_v35 = vadd.f32 %v1127_v49, %v729_v22  ;;  %1248 = vmatprep.subr.bf16.mxu1 %v1374_v25 }
 0x2b6   : > { %v768_v36 = vmax.f32 %v738_v21, 0.0 }
 0x2b7   : > { %v766_v23 = vmax.f32 %v730_v35, 0.0 }
 0x2b8   : > { %v860_v18 = vpack.c.bf16 %v768_v36, %v767_v20 }
 0x2b9   : > { %v859_v24 = vpack.c.bf16 %v766_v23, %v765_v9  ;;  %v1242_v53 = vpop.f32.mrb[20].mxu0 }
 0x2ba   : > { %v751_v26 = vadd.f32 %v1242_v53, %v1127_v49  ;;  %v742_v27 = vpop.f32.mrb[21].mxu0  ;;  %v883_v50 = vsel %vm863_vm2, %v860_v18, 0 }
 0x2bb   : > { %v743_v31 = vadd.f32 %v1127_v49, %v742_v27  ;;  %v1243_v8 = vpop.f32.mrb[22].mxu0  ;;  %v880_v48 = vsel %vm863_vm2, %v859_v24, 0 }
 0x2bc   : > { %1249 = vmatpush3.bf16.xpose.msra.mxu1 %v874_v28  ;;  %v771_v37 = vmax.f32 %v751_v26, 0.0  ;;  %v754_v38 = vadd.f32 %v1243_v8, %v1127_v49  ;;  %v745_v39 = vpop.f32.mrb[23].mxu0 }
 0x2bd   : > { %1250 = vmatprep.subr.bf16.mxu1 %v1374_v25  ;;  %v769_v40 = vmax.f32 %v743_v31, 0.0  ;;  %v746_v41 = vadd.f32 %v1127_v49, %v745_v39 }
 0x2be   : > { %v772_v42 = vmax.f32 %v754_v38, 0.0 }
 0x2bf   : > { %v770_v43 = vmax.f32 %v746_v41, 0.0 }
 0x2c0   : > { %v862_v44 = vpack.c.bf16 %v772_v42, %v771_v37 }
 0x2c1   : > { %v861_v45 = vpack.c.bf16 %v770_v43, %v769_v40 }
 0x2c2   : > { %v889_v12 = vsel %vm863_vm2, %v862_v44, 0 }
 0x2c3   : > { %v886_v49 = vsel %vm863_vm2, %v861_v45, 0 }
 0x2c4   : > { %1251 = vmatpush3.bf16.xpose.msra.mxu1 %v877_v47 }
 0x2c5   : > { %1252 = vmatprep.subr.bf16.mxu1 %v1374_v25 }
 0x2cc   : > { %1253 = vmatpush3.bf16.xpose.msra.mxu1 %v880_v48 }
 0x2cd   : > { %1254 = vmatprep.subr.bf16.mxu1 %v1374_v25 }
 0x2d4   : > { %1255 = vmatpush3.bf16.xpose.msra.mxu1 %v883_v50 }
 0x2d5   : > { %1256 = vmatprep.subr.bf16.mxu1 %v1374_v25 }
 0x2dc   : > { %1257 = vmatpush3.bf16.xpose.msra.mxu1 %v886_v49 }
 0x2dd   : > { %1258 = vmatprep.subr.bf16.mxu1 %v1374_v25 }
 0x2e4   : > { %1259 = vmatpush3.bf16.xpose.msra.mxu1 %v889_v12 }
 0x2eb   : > { %1261 = vmatmul.mubr.msk.bf16.vlgmr.msra.gmra.mrb[24].mxu1 %vm863_vm2, %v1605_v46 }
 0x326   : > { %v1021_v30 = vpop.f32.mrb[24].mxu0 }
 0x327   : > { %v1282_v5 = vpop.f32.mrb[25].mxu0  ;;  %v1028_v2 = vrot.slane %v1021_v30, 1 }
 0x328   : > { %v1024_v29 = vpop.f32.mrb[26].mxu0 }
 0x329   : > { %v1283_v51 = vpop.f32.mrb[27].mxu0 }
 0x3be   : > { %v925_v11 = vpop.f32.mrb[24].mxu1 }
 0x3bf   : > { %v1030_v54 = vadd.f32 %v1028_v2, %v925_v11  ;;  %v1262_v55 = vpop.f32.mrb[25].mxu1 }
 0x3c0   : > { %v928_v3 = vpop.f32.mrb[26].mxu1 }
 0x3c1   : > { %v1036_v14 = vadd.f32 %v1034_v52, %v1030_v54  ;;  %v1263_v25 = vpop.f32.mrb[27].mxu1 }
 0x3c3   : > { %v1139_v6 = vmul.f32 -1.442695, %v1036_v14 }
 0x3c5   : > { %1360 = vpow2.f32 %v1139_v6 }
 0x3cf   : > { %v1361_v4 = vpop.eup %1360 }
 0x3d0   : > { %v1040_v32 = vadd.f32 1.0, %v1361_v4 }
 0x3d2   : > { %1362 = vrcp.f32 %v1040_v32 }
 0x3dc   : > { %v1363_v46 = vpop.eup %1362 }
 0x3dd   : > { %1043 = vst [vmem:[%s222_s24] sm:$0x1] %v1363_v46 }
 0x3de PF: > { %s15_s18 = sadd.s32 1, %s1370_s18  }
 0x3df   : > { %p12_p5 = scmp.ge.s32.totalorder %s15_s18, 5  }
 0x3e1   :  { %14 = sbr.rel (!%p12_p5) target bundleno = 1 (0x1), region = 70 }

</bundles_post_ra>
